<compile_context>
chip_gen: v7x
topology: tpu7x:2x2x1
jax: 0.10.0
libtpu: 0.0.40
codegen_flags: <defaults>
</compile_context>

<pallas_src>
import jax
import jax.numpy as jnp
from jax.experimental import pallas as pl
from jax.experimental.pallas import tpu as pltpu

EPS = 1e-5        # PyTorch BatchNorm1d default
OUT_DIM = 14      # final Linear output features in the PyTorch module
LANE = 128        # TPU lane width


def _round_up(n, m=LANE):
    return ((n + m - 1) // m) * m


def _mlp_kernel(s_ref, a_ref,
                w1s_ref, w1a_ref, b1_ref, g1_ref, be1_ref,
                w2_ref, b2_ref, g2_ref, be2_ref,
                w3_ref, b3_ref,
                w4_ref, b4_ref,
                out_ref):
    """Fused: (implicit concat) Linear->BN->ReLU->Linear->BN->ReLU->Linear->ReLU->Linear."""
    s = s_ref[...]
    a = a_ref[...]
    inv_b = 1.0 / s.shape[0]  # static batch size

    def fused_bn(h, g, be):
        # Single pass over h: mean and E[h^2] together, then one scale/shift FMA.
        mean = jnp.sum(h, axis=0, keepdims=True) * inv_b
        meansq = jnp.sum(h * h, axis=0, keepdims=True) * inv_b
        var = jnp.maximum(meansq - mean * mean, 0.0)   # guard tiny negative rounding
        scale = g * jax.lax.rsqrt(var + EPS)
        shift = be - mean * scale
        return h * scale + shift

    # --- Layer 1: split-weight linear (== concat(state,action) @ W1) + BN + ReLU
    h = (jnp.dot(s, w1s_ref[...], preferred_element_type=jnp.float32)
         + jnp.dot(a, w1a_ref[...], preferred_element_type=jnp.float32)
         + b1_ref[...])
    h = jnp.maximum(fused_bn(h, g1_ref[...], be1_ref[...]), 0.0)

    # --- Layer 2: Linear + BN + ReLU
    h = jnp.dot(h, w2_ref[...], preferred_element_type=jnp.float32) + b2_ref[...]
    h = jnp.maximum(fused_bn(h, g2_ref[...], be2_ref[...]), 0.0)

    # --- Output layer: Linear + ReLU + Linear (lane-dense padded output)
    h = jnp.maximum(jnp.dot(h, w3_ref[...], preferred_element_type=jnp.float32)
                    + b3_ref[...], 0.0)
    out = jnp.dot(h, w4_ref[...], preferred_element_type=jnp.float32) + b4_ref[...]
    out_ref[...] = out.astype(out_ref.dtype)


@jax.jit
def model_net_forward(state, action, params):
    """Pallas-backed forward.  state: (B, Sd) f32, action: (B, Ad) f32 -> (B, 14) f32."""
    state = state.astype(jnp.float32)
    action = action.astype(jnp.float32)
    B = state.shape[0]

    args = (
        state, action,
        params["w1_s"], params["w1_a"], params["b1"], params["g1"], params["be1"],
        params["w2"], params["b2"], params["g2"], params["be2"],
        params["w3"], params["b3"],
        params["w4"], params["b4"],
    )

    # Advisory cost estimate for XLA's scheduler (shapes are static under jit).
    Sd, Ad = state.shape[1], action.shape[1]
    H1 = params["w1_s"].shape[1]
    H2 = params["w2"].shape[1]
    H3 = params["w3"].shape[1]
    Op = params["w4"].shape[1]
    flops = 2 * B * (Sd * H1 + Ad * H1 + H1 * H2 + H2 * H3 + H3 * Op)
    bytes_accessed = (sum(x.size * x.dtype.itemsize for x in args)
                      + B * Op * 4)
    cost = pl.CostEstimate(flops=flops,
                           transcendentals=H1 + H2,      # two rsqrt rows
                           bytes_accessed=bytes_accessed)

    out_padded = pl.pallas_call(
        _mlp_kernel,
        out_shape=jax.ShapeDtypeStruct((B, Op), jnp.float32),
        in_specs=[pl.BlockSpec(memory_space=pltpu.MemorySpace.VMEM)] * len(args),
        out_specs=pl.BlockSpec(memory_space=pltpu.MemorySpace.VMEM),
        cost_estimate=cost,
    )(*args)
    # Padded columns are exactly zero by construction; slice back to 14.
    return out_padded[:, :OUT_DIM]


def init_params(key, state_dim, action_dim, hidden_size, out_dim=OUT_DIM):
    """Parameters mirroring the PyTorch module, stored kernel-friendly:

    * Linear weights pre-transposed to (in_features, out_features) so the
      kernel computes x @ W (== PyTorch x @ W.T).
    * Layer-1 weight generated as one (input_size, h1) matrix (PyTorch fan-in
      for the init bound), then split row-wise into state / action halves so
      the kernel never concatenates.
    * All out-feature dims zero-padded to the 128-lane width; padded
      rows/columns contribute exactly zero, so the math is unchanged.
    * Biases / BN affine params stored as (1, features) for 2-D broadcast.
    """
    input_size = state_dim + action_dim
    h1, h2, h3 = hidden_size
    h1p, h2p, h3p = _round_up(h1), _round_up(h2), _round_up(h3)
    outp = _round_up(out_dim)
    keys = jax.random.split(key, 8)

    def linear(kw, kb, fan_in, fan_out, pad_in, pad_out):
        bound = 1.0 / (fan_in ** 0.5)
        w = jax.random.uniform(kw, (fan_in, fan_out), jnp.float32, -bound, bound)
        b = jax.random.uniform(kb, (1, fan_out), jnp.float32, -bound, bound)
        w = jnp.pad(w, ((0, pad_in - fan_in), (0, pad_out - fan_out)))
        b = jnp.pad(b, ((0, 0), (0, pad_out - fan_out)))
        return w, b

    params = {}
    w1, b1 = linear(keys[0], keys[1], input_size, h1, input_size, h1p)
    params["w1_s"] = w1[:state_dim]       # (state_dim, h1p)
    params["w1_a"] = w1[state_dim:]       # (action_dim, h1p)
    params["b1"] = b1
    params["w2"], params["b2"] = linear(keys[2], keys[3], h1, h2, h1p, h2p)
    params["w3"], params["b3"] = linear(keys[4], keys[5], h2, h3, h2p, h3p)
    params["w4"], params["b4"] = linear(keys[6], keys[7], h3, out_dim, h3p, outp)
    # BatchNorm1d default affine init: gamma = 1, beta = 0 (padded cols harmless).
    params["g1"] = jnp.ones((1, h1p), jnp.float32)
    params["be1"] = jnp.zeros((1, h1p), jnp.float32)
    params["g2"] = jnp.ones((1, h2p), jnp.float32)
    params["be2"] = jnp.zeros((1, h2p), jnp.float32)
    return params
    # TODO(synk): running_mean / running_var buffer updates of BatchNorm1d are
    # not modeled (pure forward only, as in the PyTorch module's forward()).


def reference_forward(state, action, params):
    """Pure-JAX reference with PyTorch train-mode BatchNorm semantics
    (two-pass biased variance) using the same padded parameters."""
    def bn(h, g, be):
        m = jnp.mean(h, axis=0, keepdims=True)
        v = jnp.mean((h - m) ** 2, axis=0, keepdims=True)
        return (h - m) / jnp.sqrt(v + EPS) * g + be

    h = state @ params["w1_s"] + action @ params["w1_a"] + params["b1"]
    h = jnp.maximum(bn(h, params["g1"], params["be1"]), 0.0)
    h = h @ params["w2"] + params["b2"]
    h = jnp.maximum(bn(h, params["g2"], params["be2"]), 0.0)
    h = jnp.maximum(h @ params["w3"] + params["b3"], 0.0)
    out = h @ params["w4"] + params["b4"]
    return out[:, :OUT_DIM]


if __name__ == "__main__":
    # Small shapes consistent with the module:
    #   state_dim=10, action_dim=6 -> input_size=16, hidden=[32,32,32], out=14, batch=8
    batch, state_dim, action_dim = 8, 10, 6
    hidden_size = [32, 32, 32]

    key = jax.random.PRNGKey(0)
    k_state, k_action, k_params = jax.random.split(key, 3)
    state = jax.random.normal(k_state, (batch, state_dim), jnp.float32)
    action = jax.random.normal(k_action, (batch, action_dim), jnp.float32)
    params = init_params(k_params, state_dim, action_dim, hidden_size)

    out = jax.block_until_ready(model_net_forward(state, action, params))
    ref = jax.block_until_ready(reference_forward(state, action, params))

    assert out.shape == (batch, OUT_DIM), out.shape
    assert jnp.allclose(out, ref, atol=1e-4, rtol=1e-4), "mismatch vs reference"

    print("KERNEL_OK")
</pallas_src>

<mosaic_0001>
module attributes {stable_mosaic.version = 11 : i64} {
  func.func @_mlp_kernel(%arg0: memref<8x10xf32, #tpu.memory_space<vmem>>, %arg1: memref<8x6xf32, #tpu.memory_space<vmem>>, %arg2: memref<10x128xf32, #tpu.memory_space<vmem>>, %arg3: memref<6x128xf32, #tpu.memory_space<vmem>>, %arg4: memref<1x128xf32, #tpu.memory_space<vmem>>, %arg5: memref<1x128xf32, #tpu.memory_space<vmem>>, %arg6: memref<1x128xf32, #tpu.memory_space<vmem>>, %arg7: memref<128x128xf32, #tpu.memory_space<vmem>>, %arg8: memref<1x128xf32, #tpu.memory_space<vmem>>, %arg9: memref<1x128xf32, #tpu.memory_space<vmem>>, %arg10: memref<1x128xf32, #tpu.memory_space<vmem>>, %arg11: memref<128x128xf32, #tpu.memory_space<vmem>>, %arg12: memref<1x128xf32, #tpu.memory_space<vmem>>, %arg13: memref<128x128xf32, #tpu.memory_space<vmem>>, %arg14: memref<1x128xf32, #tpu.memory_space<vmem>>, %arg15: memref<8x128xf32, #tpu.memory_space<vmem>>) attributes {dimension_semantics = [], scalar_prefetch = 0 : i64, scratch_operands = 0 : i64, tpu.core_type = #tpu.core_type<tc>} {
    %c0 = arith.constant 0 : index
    %c0_0 = arith.constant 0 : index
    %0 = vector.load %arg0[%c0, %c0_0] : memref<8x10xf32, #tpu.memory_space<vmem>>, vector<8x10xf32>
    %c0_1 = arith.constant 0 : index
    %c0_2 = arith.constant 0 : index
    %1 = vector.load %arg1[%c0_1, %c0_2] : memref<8x6xf32, #tpu.memory_space<vmem>>, vector<8x6xf32>
    %c0_3 = arith.constant 0 : index
    %c0_4 = arith.constant 0 : index
    %2 = vector.load %arg2[%c0_3, %c0_4] : memref<10x128xf32, #tpu.memory_space<vmem>>, vector<10x128xf32>
    %cst = arith.constant dense<0.000000e+00> : vector<8x128xf32>
    %3 = tpu.matmul %0, %2, %cst {dimension_numbers = #tpu.dot_dimension_numbers<[1], [0], [0], [1], [0, 0, 1, 1], [], []>} : vector<8x10xf32>, vector<10x128xf32>, vector<8x128xf32> -> vector<8x128xf32>
    %c0_5 = arith.constant 0 : index
    %c0_6 = arith.constant 0 : index
    %4 = vector.load %arg3[%c0_5, %c0_6] : memref<6x128xf32, #tpu.memory_space<vmem>>, vector<6x128xf32>
    %cst_7 = arith.constant dense<0.000000e+00> : vector<8x128xf32>
    %5 = tpu.matmul %1, %4, %cst_7 {dimension_numbers = #tpu.dot_dimension_numbers<[1], [0], [0], [1], [0, 0, 1, 1], [], []>} : vector<8x6xf32>, vector<6x128xf32>, vector<8x128xf32> -> vector<8x128xf32>
    %6 = arith.addf %3, %5 : vector<8x128xf32>
    %c0_8 = arith.constant 0 : index
    %c0_9 = arith.constant 0 : index
    %7 = vector.load %arg4[%c0_8, %c0_9] : memref<1x128xf32, #tpu.memory_space<vmem>>, vector<1x128xf32>
    %8 = vector.broadcast %7 : vector<1x128xf32> to vector<8x128xf32>
    %9 = arith.addf %6, %8 : vector<8x128xf32>
    %c0_10 = arith.constant 0 : index
    %c0_11 = arith.constant 0 : index
    %10 = vector.load %arg5[%c0_10, %c0_11] : memref<1x128xf32, #tpu.memory_space<vmem>>, vector<1x128xf32>
    %c0_12 = arith.constant 0 : index
    %c0_13 = arith.constant 0 : index
    %11 = vector.load %arg6[%c0_12, %c0_13] : memref<1x128xf32, #tpu.memory_space<vmem>>, vector<1x128xf32>
    %cst_14 = arith.constant dense<0.000000e+00> : vector<128xf32>
    %12 = vector.multi_reduction <add>, %9, %cst_14 [0] : vector<8x128xf32> to vector<128xf32>
    %13 = vector.shape_cast %12 : vector<128xf32> to vector<1x128xf32>
    %cst_15 = arith.constant 1.250000e-01 : f32
    %14 = vector.broadcast %cst_15 : f32 to vector<1x128xf32>
    %15 = arith.mulf %13, %14 : vector<1x128xf32>
    %16 = arith.mulf %9, %9 : vector<8x128xf32>
    %cst_16 = arith.constant dense<0.000000e+00> : vector<128xf32>
    %17 = vector.multi_reduction <add>, %16, %cst_16 [0] : vector<8x128xf32> to vector<128xf32>
    %18 = vector.shape_cast %17 : vector<128xf32> to vector<1x128xf32>
    %cst_17 = arith.constant 1.250000e-01 : f32
    %19 = vector.broadcast %cst_17 : f32 to vector<1x128xf32>
    %20 = arith.mulf %18, %19 : vector<1x128xf32>
    %21 = arith.mulf %15, %15 : vector<1x128xf32>
    %22 = arith.subf %20, %21 : vector<1x128xf32>
    %cst_18 = arith.constant 0.000000e+00 : f32
    %23 = vector.broadcast %cst_18 : f32 to vector<1x128xf32>
    %24 = arith.maximumf %22, %23 : vector<1x128xf32>
    %cst_19 = arith.constant 9.99999974E-6 : f32
    %25 = vector.broadcast %cst_19 : f32 to vector<1x128xf32>
    %26 = arith.addf %24, %25 : vector<1x128xf32>
    %27 = math.rsqrt %26 : vector<1x128xf32>
    %28 = arith.mulf %10, %27 : vector<1x128xf32>
    %29 = arith.mulf %15, %28 : vector<1x128xf32>
    %30 = arith.subf %11, %29 : vector<1x128xf32>
    %31 = vector.broadcast %28 : vector<1x128xf32> to vector<8x128xf32>
    %32 = arith.mulf %9, %31 : vector<8x128xf32>
    %33 = vector.broadcast %30 : vector<1x128xf32> to vector<8x128xf32>
    %34 = arith.addf %32, %33 : vector<8x128xf32>
    %cst_20 = arith.constant 0.000000e+00 : f32
    %35 = vector.broadcast %cst_20 : f32 to vector<8x128xf32>
    %36 = arith.maximumf %34, %35 : vector<8x128xf32>
    %c0_21 = arith.constant 0 : index
    %c0_22 = arith.constant 0 : index
    %37 = vector.load %arg7[%c0_21, %c0_22] : memref<128x128xf32, #tpu.memory_space<vmem>>, vector<128x128xf32>
    %cst_23 = arith.constant dense<0.000000e+00> : vector<8x128xf32>
    %38 = tpu.matmul %36, %37, %cst_23 {dimension_numbers = #tpu.dot_dimension_numbers<[1], [0], [0], [1], [0, 0, 1, 1], [], []>} : vector<8x128xf32>, vector<128x128xf32>, vector<8x128xf32> -> vector<8x128xf32>
    %c0_24 = arith.constant 0 : index
    %c0_25 = arith.constant 0 : index
    %39 = vector.load %arg8[%c0_24, %c0_25] : memref<1x128xf32, #tpu.memory_space<vmem>>, vector<1x128xf32>
    %40 = vector.broadcast %39 : vector<1x128xf32> to vector<8x128xf32>
    %41 = arith.addf %38, %40 : vector<8x128xf32>
    %c0_26 = arith.constant 0 : index
    %c0_27 = arith.constant 0 : index
    %42 = vector.load %arg9[%c0_26, %c0_27] : memref<1x128xf32, #tpu.memory_space<vmem>>, vector<1x128xf32>
    %c0_28 = arith.constant 0 : index
    %c0_29 = arith.constant 0 : index
    %43 = vector.load %arg10[%c0_28, %c0_29] : memref<1x128xf32, #tpu.memory_space<vmem>>, vector<1x128xf32>
    %cst_30 = arith.constant dense<0.000000e+00> : vector<128xf32>
    %44 = vector.multi_reduction <add>, %41, %cst_30 [0] : vector<8x128xf32> to vector<128xf32>
    %45 = vector.shape_cast %44 : vector<128xf32> to vector<1x128xf32>
    %cst_31 = arith.constant 1.250000e-01 : f32
    %46 = vector.broadcast %cst_31 : f32 to vector<1x128xf32>
    %47 = arith.mulf %45, %46 : vector<1x128xf32>
    %48 = arith.mulf %41, %41 : vector<8x128xf32>
    %cst_32 = arith.constant dense<0.000000e+00> : vector<128xf32>
    %49 = vector.multi_reduction <add>, %48, %cst_32 [0] : vector<8x128xf32> to vector<128xf32>
    %50 = vector.shape_cast %49 : vector<128xf32> to vector<1x128xf32>
    %cst_33 = arith.constant 1.250000e-01 : f32
    %51 = vector.broadcast %cst_33 : f32 to vector<1x128xf32>
    %52 = arith.mulf %50, %51 : vector<1x128xf32>
    %53 = arith.mulf %47, %47 : vector<1x128xf32>
    %54 = arith.subf %52, %53 : vector<1x128xf32>
    %cst_34 = arith.constant 0.000000e+00 : f32
    %55 = vector.broadcast %cst_34 : f32 to vector<1x128xf32>
    %56 = arith.maximumf %54, %55 : vector<1x128xf32>
    %cst_35 = arith.constant 9.99999974E-6 : f32
    %57 = vector.broadcast %cst_35 : f32 to vector<1x128xf32>
    %58 = arith.addf %56, %57 : vector<1x128xf32>
    %59 = math.rsqrt %58 : vector<1x128xf32>
    %60 = arith.mulf %42, %59 : vector<1x128xf32>
    %61 = arith.mulf %47, %60 : vector<1x128xf32>
    %62 = arith.subf %43, %61 : vector<1x128xf32>
    %63 = vector.broadcast %60 : vector<1x128xf32> to vector<8x128xf32>
    %64 = arith.mulf %41, %63 : vector<8x128xf32>
    %65 = vector.broadcast %62 : vector<1x128xf32> to vector<8x128xf32>
    %66 = arith.addf %64, %65 : vector<8x128xf32>
    %cst_36 = arith.constant 0.000000e+00 : f32
    %67 = vector.broadcast %cst_36 : f32 to vector<8x128xf32>
    %68 = arith.maximumf %66, %67 : vector<8x128xf32>
    %c0_37 = arith.constant 0 : index
    %c0_38 = arith.constant 0 : index
    %69 = vector.load %arg11[%c0_37, %c0_38] : memref<128x128xf32, #tpu.memory_space<vmem>>, vector<128x128xf32>
    %cst_39 = arith.constant dense<0.000000e+00> : vector<8x128xf32>
    %70 = tpu.matmul %68, %69, %cst_39 {dimension_numbers = #tpu.dot_dimension_numbers<[1], [0], [0], [1], [0, 0, 1, 1], [], []>} : vector<8x128xf32>, vector<128x128xf32>, vector<8x128xf32> -> vector<8x128xf32>
    %c0_40 = arith.constant 0 : index
    %c0_41 = arith.constant 0 : index
    %71 = vector.load %arg12[%c0_40, %c0_41] : memref<1x128xf32, #tpu.memory_space<vmem>>, vector<1x128xf32>
    %72 = vector.broadcast %71 : vector<1x128xf32> to vector<8x128xf32>
    %73 = arith.addf %70, %72 : vector<8x128xf32>
    %cst_42 = arith.constant 0.000000e+00 : f32
    %74 = vector.broadcast %cst_42 : f32 to vector<8x128xf32>
    %75 = arith.maximumf %73, %74 : vector<8x128xf32>
    %c0_43 = arith.constant 0 : index
    %c0_44 = arith.constant 0 : index
    %76 = vector.load %arg13[%c0_43, %c0_44] : memref<128x128xf32, #tpu.memory_space<vmem>>, vector<128x128xf32>
    %cst_45 = arith.constant dense<0.000000e+00> : vector<8x128xf32>
    %77 = tpu.matmul %75, %76, %cst_45 {dimension_numbers = #tpu.dot_dimension_numbers<[1], [0], [0], [1], [0, 0, 1, 1], [], []>} : vector<8x128xf32>, vector<128x128xf32>, vector<8x128xf32> -> vector<8x128xf32>
    %c0_46 = arith.constant 0 : index
    %c0_47 = arith.constant 0 : index
    %78 = vector.load %arg14[%c0_46, %c0_47] : memref<1x128xf32, #tpu.memory_space<vmem>>, vector<1x128xf32>
    %79 = vector.broadcast %78 : vector<1x128xf32> to vector<8x128xf32>
    %80 = arith.addf %77, %79 : vector<8x128xf32>
    %c0_48 = arith.constant 0 : index
    %c0_49 = arith.constant 0 : index
    %81 = vector.load %arg15[%c0_48, %c0_49] : memref<8x128xf32, #tpu.memory_space<vmem>>, vector<8x128xf32>
    tpu.vector_store %arg15[%c0_48, %c0_49], %80 {strides = array<i32>} : memref<8x128xf32, #tpu.memory_space<vmem>>, vector<8x128xf32>,
    return
  }
}

</mosaic_0001>

<bundles_post_ra>
// kernel: model_net_forward.1
= control target key start
LH: loop header
LB: loop body
LE: loop exit
PB: predicated region body
PF: predicated region fallthrough
CT: control target
= control target key end

     0   :  { %20 = vsyncpa [#allocation3], 0  ;;  %s1415_s0 = inlined_call_operand.hbm [shape: f32[8,10], index: 0, kind: input, shape index: {}]   ;;  %s1416_s1 = inlined_call_operand.hbm [shape: f32[8,6], index: 1, kind: input, shape index: {}]   ;;  %s1417_s2 = inlined_call_operand.vmem [shape: f32[10,128], index: 2, kind: input, shape index: {}]   ;;  %s1418_s3 = inlined_call_operand.vmem [shape: f32[6,128], index: 3, kind: input, shape index: {}]   ;;  %s1419_s4 = inlined_call_operand.vmem [shape: f32[1,128], index: 4, kind: input, shape index: {}]   ;;  %s1420_s5 = inlined_call_operand.vmem [shape: f32[1,128], index: 5, kind: input, shape index: {}]   ;;  %s1421_s6 = inlined_call_operand.vmem [shape: f32[1,128], index: 6, kind: input, shape index: {}]   ;;  %s1422_s7 = inlined_call_operand.hbm [shape: f32[128,128], index: 7, kind: input, shape index: {}]   ;;  %s1423_s8 = inlined_call_operand.vmem [shape: f32[1,128], index: 8, kind: input, shape index: {}]   ;;  %s1424_s9 = inlined_call_operand.vmem [shape: f32[1,128], index: 9, kind: input, shape index: {}]   ;;  %s1425_s10 = inlined_call_operand.vmem [shape: f32[1,128], index: 10, kind: input, shape index: {}]   ;;  %s1426_s11 = inlined_call_operand.hbm [shape: f32[128,128], index: 11, kind: input, shape index: {}]   ;;  %s1427_s12 = inlined_call_operand.hbm [shape: f32[1,128], index: 12, kind: input, shape index: {}]   ;;  %s1428_s13 = inlined_call_operand.hbm [shape: f32[128,128], index: 13, kind: input, shape index: {}]   ;;  %s1429_s14 = inlined_call_operand.hbm [shape: f32[1,128], index: 14, kind: input, shape index: {}]   ;;  %s1430_s15 = inlined_call_operand.hbm [shape: f32[8,128], index: 15, kind: output, shape index: {}]  }
   0x1   :  { %21 = vsyncpa [#allocation6], 0 }
   0x2   :  { %22 = vsyncpa [#allocation9], 0 }
   0x3   :  { %23 = vsyncpa [#allocation12], 0 }
   0x4   :  { %24 = vsyncpa [#allocation4], 0  ;;  %s1147_s18 = smov [#allocation5]   ;;  %s961_s22 = scalar_lea.hbm %s1416_s1, 128 }
   0x5   :  { %s41_s19 = sshll.u32 %s1147_s18, 4  ;;  %p962_p0 = scmp.ne.s32.totalorder %s1416_s1, %s961_s22  ;;  %s42_s19 = int_to_ptr.vmem [resolvable:$true] %s41_s19 }
   0x6   :  { %p965_p1 = scmp.lt.u32.totalorder %s961_s22, %s1416_s1 }
   0x8   :  { %p967_p2 = pnand %p965_p1, %p962_p0 }
   0xa   :  { %970 = shalt.err (!%p967_p2)
}
   0xb   :  { %s971_s27 = scalar_lea.vmem %s42_s19, 128  ;;  %p976_p4 = scmp.lt.s32.totalorder %s42_s19, %s42_s19 }
   0xc   :  { %p972_p3 = scmp.ne.s32.totalorder %s42_s19, %s971_s27  ;;  %p977_p5 = scmp.lt.s32.totalorder %s971_s27, %s971_s27 }
   0xe   :  { %p978_p6 = por %p977_p5, %p976_p4 }
  0x10   :  { %p979_p7 = pnand %p978_p6, %p972_p3 }
  0x12   :  { %982 = shalt.err (!%p979_p7)
}
  0x13   :  { %44 = dma.hbm_to_vmem [thread:$0]  %s1416_s1, 128, %s42_s19, [#allocation6]  }
  0x14   :  { %s1148_s30 = smov [#allocation8]   ;;  %s1149_s17 = smov [#allocation11]  }
  0x15   :  { %s78_s16 = sshll.u32 %s1148_s30, 4  ;;  %s100_s18 = sshll.u32 %s1149_s17, 4  ;;  %s79_s16 = int_to_ptr.vmem [resolvable:$true] %s78_s16  ;;  %s101_s18 = int_to_ptr.vmem [resolvable:$true] %s100_s18 }
  0x16   :  { %s983_s22 = scalar_lea.hbm %s1426_s11, 2048 }
  0x17   :  { %p984_p8 = scmp.ne.s32.totalorder %s1426_s11, %s983_s22  ;;  %p987_p9 = scmp.lt.u32.totalorder %s983_s22, %s1426_s11 }
  0x19   :  { %p989_p10 = pnand %p987_p9, %p984_p8 }
  0x1b   :  { %992 = shalt.err (!%p989_p10)
}
  0x1c   :  { %s993_s1 = scalar_lea.vmem %s79_s16, 2048  ;;  %p998_p12 = scmp.lt.s32.totalorder %s79_s16, %s79_s16 }
  0x1d   :  { %p994_p11 = scmp.ne.s32.totalorder %s79_s16, %s993_s1  ;;  %p999_p13 = scmp.lt.s32.totalorder %s993_s1, %s993_s1 }
  0x1f   :  { %p1000_p0 = por %p999_p13, %p998_p12 }
  0x21   :  { %p1001_p1 = pnand %p1000_p0, %p994_p11 }
  0x23   :  { %1004 = shalt.err (!%p1001_p1)
}
  0x24   :  { %s1150_s19 = smov 128   ;;  %s1151_s27 = smov 8  }
  0x25   :  { %84 = dma.hbm_to_vmem [thread:$0]  %s1426_s11, 2048, %s79_s16, [#allocation9], %s1150_s19, %s1150_s19, %s1151_s27  }
  0x26   :  { %s1005_s20 = scalar_lea.hbm %s1428_s13, 2048 }
  0x27   :  { %p1006_p2 = scmp.ne.s32.totalorder %s1428_s13, %s1005_s20  ;;  %p1009_p3 = scmp.lt.u32.totalorder %s1005_s20, %s1428_s13 }
  0x29   :  { %p1011_p4 = pnand %p1009_p3, %p1006_p2 }
  0x2b   :  { %1014 = shalt.err (!%p1011_p4)
}
  0x2c   :  { %s1015_s25 = scalar_lea.vmem %s101_s18, 2048  ;;  %p1020_p6 = scmp.lt.s32.totalorder %s101_s18, %s101_s18 }
  0x2d   :  { %p1016_p5 = scmp.ne.s32.totalorder %s101_s18, %s1015_s25  ;;  %p1021_p7 = scmp.lt.s32.totalorder %s1015_s25, %s1015_s25 }
  0x2f   :  { %p1022_p8 = por %p1021_p7, %p1020_p6 }
  0x31   :  { %p1023_p9 = pnand %p1022_p8, %p1016_p5 }
  0x33   :  { %1026 = shalt.err (!%p1023_p9)
}
  0x34   :  { %106 = dma.hbm_to_vmem [thread:$0]  %s1428_s13, 2048, %s101_s18, [#allocation12], %s1150_s19, %s1150_s19, %s1151_s27  }
  0x35   :  { %s1152_s26 = smov [#allocation2]   ;;  %s1153_s28 = smov [#allocation7]  }
  0x36   :  { %s31_s1 = sshll.u32 %s1152_s26, 4  ;;  %s60_s29 = sshll.u32 %s1153_s28, 4  ;;  %s32_s1 = int_to_ptr.vmem [resolvable:$true] %s31_s1  ;;  %s61_s29 = int_to_ptr.vmem [resolvable:$true] %s60_s29 }
  0x37   :  { %s1027_s20 = scalar_lea.hbm %s1415_s0, 128 }
  0x38   :  { %p1028_p10 = scmp.ne.s32.totalorder %s1415_s0, %s1027_s20  ;;  %p1031_p11 = scmp.lt.u32.totalorder %s1027_s20, %s1415_s0 }
  0x3a   :  { %p1033_p12 = pnand %p1031_p11, %p1028_p10 }
  0x3c   :  { %1036 = shalt.err (!%p1033_p12)
}
  0x3d   :  { %s1037_s13 = scalar_lea.vmem %s32_s1, 128  ;;  %p1042_p0 = scmp.lt.s32.totalorder %s32_s1, %s32_s1 }
  0x3e   :  { %p1038_p13 = scmp.ne.s32.totalorder %s32_s1, %s1037_s13  ;;  %p1043_p1 = scmp.lt.s32.totalorder %s1037_s13, %s1037_s13 }
  0x40   :  { %p1044_p2 = por %p1043_p1, %p1042_p0 }
  0x42   :  { %p1045_p3 = pnand %p1044_p2, %p1038_p13 }
  0x44   :  { %1048 = shalt.err (!%p1045_p3)
}
  0x45   :  { %34 = dma.hbm_to_vmem [thread:$0]  %s1415_s0, 128, %s32_s1, [#allocation3]  }
  0x46   :  { %s1049_s26 = scalar_lea.hbm %s1422_s7, 2048 }
  0x47   :  { %p1050_p4 = scmp.ne.s32.totalorder %s1422_s7, %s1049_s26  ;;  %p1053_p5 = scmp.lt.u32.totalorder %s1049_s26, %s1422_s7 }
  0x49   :  { %p1055_p6 = pnand %p1053_p5, %p1050_p4 }
  0x4b   :  { %1058 = shalt.err (!%p1055_p6)
}
  0x4c   :  { %s1059_s21 = scalar_lea.vmem %s61_s29, 2048  ;;  %p1064_p8 = scmp.lt.s32.totalorder %s61_s29, %s61_s29 }
  0x4d   :  { %p1060_p7 = scmp.ne.s32.totalorder %s61_s29, %s1059_s21  ;;  %p1065_p9 = scmp.lt.s32.totalorder %s1059_s21, %s1059_s21 }
  0x4f   :  { %p1066_p10 = por %p1065_p9, %p1064_p8 }
  0x51   :  { %p1067_p11 = pnand %p1066_p10, %p1060_p7 }
  0x53   :  { %1070 = shalt.err (!%p1067_p11)
}
  0x54   :  { %66 = dma.hbm_to_vmem [thread:$0]  %s1422_s7, 2048, %s61_s29, [#allocation6], %s1150_s19, %s1150_s19, %s1151_s27  }
  0x55   :  { %s1154_s22 = smov [#allocation10]   ;;  %s1155_s24 = smov [#allocation13]  }
  0x56   :  { %s91_s23 = sshll.u32 %s1154_s22, 4  ;;  %s113_s13 = sshll.u32 %s1155_s24, 4  ;;  %s92_s23 = int_to_ptr.vmem [resolvable:$true] %s91_s23  ;;  %s114_s13 = int_to_ptr.vmem [resolvable:$true] %s113_s13 }
  0x57   :  { %s1071_s11 = scalar_lea.hbm %s1427_s12, 16 }
  0x58   :  { %p1072_p12 = scmp.ne.s32.totalorder %s1427_s12, %s1071_s11  ;;  %p1075_p13 = scmp.lt.u32.totalorder %s1071_s11, %s1427_s12 }
  0x5a   :  { %p1077_p0 = pnand %p1075_p13, %p1072_p12 }
  0x5c   :  { %1080 = shalt.err (!%p1077_p0)
}
  0x5d   :  { %s1081_s7 = scalar_lea.vmem %s92_s23, 16  ;;  %s1085_s19 = scalar_lea.vmem %s92_s23, 32 }
  0x5e   :  { %p1082_p1 = scmp.ne.s32.totalorder %s92_s23, %s1081_s7  ;;  %p1086_p2 = scmp.lt.s32.totalorder %s92_s23, %s92_s23 }
  0x5f   :  { %p1087_p3 = scmp.lt.s32.totalorder %s1085_s19, %s1081_s7 }
  0x61   :  { %p1088_p4 = por %p1087_p3, %p1086_p2 }
  0x63   :  { %p1089_p5 = pnand %p1088_p4, %p1082_p1 }
  0x65   :  { %1092 = shalt.err (!%p1089_p5)
}
  0x66   :  { %94 = dma.hbm_to_vmem [thread:$0]  %s1427_s12, 16, %s92_s23, [#allocation9]  }
  0x67   :  { %s1093_s21 = scalar_lea.hbm %s1429_s14, 16 }
  0x68   :  { %p1094_p6 = scmp.ne.s32.totalorder %s1429_s14, %s1093_s21  ;;  %p1097_p7 = scmp.lt.u32.totalorder %s1093_s21, %s1429_s14 }
  0x6a   :  { %p1099_p8 = pnand %p1097_p7, %p1094_p6 }
  0x6c   :  { %1102 = shalt.err (!%p1099_p8)
}
  0x6d   :  { %s1103_s18 = scalar_lea.vmem %s114_s13, 16  ;;  %s1107_s25 = scalar_lea.vmem %s114_s13, 32 }
  0x6e   :  { %p1104_p9 = scmp.ne.s32.totalorder %s114_s13, %s1103_s18  ;;  %p1108_p10 = scmp.lt.s32.totalorder %s114_s13, %s114_s13 }
  0x6f   :  { %p1109_p11 = scmp.lt.s32.totalorder %s1107_s25, %s1103_s18 }
  0x71   :  { %p1110_p12 = por %p1109_p11, %p1108_p10 }
  0x73   :  { %p1111_p13 = pnand %p1110_p12, %p1104_p9 }
  0x75   :  { %1114 = shalt.err (!%p1111_p13)
}
  0x76   :  { %116 = dma.hbm_to_vmem [thread:$0]  %s1429_s14, 16, %s114_s13, [#allocation12]  }
  0x77   :  { %1137 = dma.done.wait [#allocation3], 128  }
  0x78   :  { %1138 = vsyncadd [#allocation3], 4294967168 }
  0x79   :  { %1139 = dma.done.wait [#allocation6], 2176  }
  0x7a   :  { %1140 = vsyncadd [#allocation6], 4294965120 }
  0x7b   :  { %1141 = dma.done.wait [#allocation9], 2064  }
  0x7c   :  { %1142 = vsyncadd [#allocation9], 4294965232 }
  0x7d   :  { %1143 = dma.done.wait [#allocation12], 2064  }
  0x7e   :  { %1144 = vsyncadd [#allocation12], 4294965232  ;;  %v1156_v0 = vmov 0.0   ;;  %vm1157_vm0 = vmmov 0   ;;  %v1158_v1 = vmov 0.0|0.0   ;;  %vm147_vm1 = vcmask 1045504  }
  0x7f   :  { %750 = vmatprep.subr.mxu1 %v1156_v0  ;;  %752 = vmatprep.mubr.msk.f32.mxu1 %vm1157_vm0, %v1156_v0  ;;  %vm225_vm2 = vcmask 1041408   ;;  %vm143_vm3 = vcmask 48128   ;;  %v142_v2 = vld [vmem:[%s1418_s3] sm:$0x3f]  ;;  %v139_v3 = vld [vmem:[#allocation5] sm:$0xff]  ;;  %vm1159_vm4 = vmmov 1   ;;  %v333_v58 = vlaneseq }
  0x80   :  { %871 = vmatprep.subr.bf16.mxu0 %v1158_v1  ;;  %794 = vmatprep.mubr.msk.f32.mxu0 %vm1157_vm0, %v1156_v0  ;;  %v140_v4 = vld [vmem:[%s1417_s2] sm:$0xff]  ;;  %v141_v5 = vld [vmem:[%s1417_s2 + $0x8] sm:$0x3]  ;;  %vm869_vm5 = vmpackc.low %vm225_vm2, %vm1159_vm4  ;;  %vm221_vm6 = vcmask 80896  }
  0x81   :  { %751 = vmatpush3.msk.msra.mxu1 %vm147_vm1, %v142_v2  ;;  %v868_v6 = vpack.c.bf16 %v141_v5, %v140_v4  ;;  %v138_v7 = vld [vmem:[#allocation2] sm:$0xff]  ;;  %v347_v8 = vld [vmem:[#allocation7] sm:$0xff]  ;;  %v348_v9 = vld [vmem:[#allocation7 + $0x8] sm:$0xff]  ;;  %v334_v59 = vshrl.u32 %v333_v58, 7 }
  0x82   :  { %753 = vmatmul.mubr.msk.f32.vlgmr.msra.gmra.mrb[0].mxu1 %vm143_vm3, %v139_v3  ;;  %867 = vmatprep.subr.bf16.mxu1 %v1158_v1  ;;  %v872_v10 = vpack.c.bf16 %v348_v9, %v347_v8  ;;  %v349_v11 = vld [vmem:[#allocation7 + $0x10] sm:$0xff]  ;;  %v350_v12 = vld [vmem:[#allocation7 + $0x18] sm:$0xff]  ;;  %v351_v14 = vld [vmem:[#allocation7 + $0x20] sm:$0xff] }
  0x83   :  { %759 = vmatprep.mubr.msk.f32.mxu1 %vm1157_vm0, %v1156_v0  ;;  %870 = vmatpush3.bf16.msk.msra.mxu1 %vm869_vm5, %v868_v6  ;;  %v875_v13 = vpack.c.bf16 %v350_v12, %v349_v11  ;;  %v352_v15 = vld [vmem:[#allocation7 + $0x28] sm:$0xff]  ;;  %v353_v17 = vld [vmem:[#allocation7 + $0x30] sm:$0xff]  ;;  %v354_v18 = vld [vmem:[#allocation7 + $0x38] sm:$0xff]  ;;  %v1369_v61 = vsub.s32 0, %v334_v59 }
  0x84   :  { %895 = vmatprep.subr.bf16.mxu1 %v1158_v1  ;;  %873 = vmatpush3.bf16.msra.mxu0 %v872_v10  ;;  %v878_v16 = vpack.c.bf16 %v352_v15, %v351_v14  ;;  %v881_v19 = vpack.c.bf16 %v354_v18, %v353_v17  ;;  %v355_v20 = vld [vmem:[#allocation7 + $0x40] sm:$0xff]  ;;  %v356_v21 = vld [vmem:[#allocation7 + $0x48] sm:$0xff]  ;;  %v357_v23 = vld [vmem:[#allocation7 + $0x50] sm:$0xff] }
  0x85   :  { %874 = vmatprep.subr.bf16.mxu0 %v1158_v1  ;;  %v884_v22 = vpack.c.bf16 %v356_v21, %v355_v20  ;;  %v358_v24 = vld [vmem:[#allocation7 + $0x58] sm:$0xff]  ;;  %v359_v26 = vld [vmem:[#allocation7 + $0x60] sm:$0xff]  ;;  %v360_v27 = vld [vmem:[#allocation7 + $0x68] sm:$0xff] }
  0x86   :  { %760 = vmatmul.mubr.msk.f32.vlgmr.msra.gmra.mrb[2].mxu1 %vm221_vm6, %v138_v7  ;;  %v887_v25 = vpack.c.bf16 %v358_v24, %v357_v23  ;;  %v890_v28 = vpack.c.bf16 %v360_v27, %v359_v26  ;;  %v361_v29 = vld [vmem:[#allocation7 + $0x70] sm:$0xff]  ;;  %v362_v30 = vld [vmem:[#allocation7 + $0x78] sm:$0xff]  ;;  %v690_v35 = vld [vmem:[%s1419_s4] ss:$0 sm:$0xff] }
  0x87   :  { %829 = vmatprep.mubr.msk.f32.mxu1 %vm1157_vm0, %v1156_v0  ;;  %v893_v31 = vpack.c.bf16 %v362_v30, %v361_v29  ;;  %v307_v60 = vld [vmem:[%s1420_s5] sm:$0x1]  ;;  %v481_v11 = vld [vmem:[#allocation8 + $0x8] sm:$0xff]  ;;  %v483_v14 = vld [vmem:[#allocation8 + $0x18] sm:$0xff] }
  0x88   :  { %876 = vmatpush3.bf16.msra.mxu0 %v875_v13  ;;  %v308_v2 = vld [vmem:[%s1421_s6] sm:$0x1]  ;;  %v482_v13 = vld [vmem:[#allocation8 + $0x10] sm:$0xff]  ;;  %v485_v17 = vld [vmem:[#allocation8 + $0x28] sm:$0xff] }
  0x89   :  { %877 = vmatprep.subr.bf16.mxu0 %v1158_v1  ;;  %v480_v10 = vld [vmem:[#allocation8] sm:$0xff]  ;;  %v899_v15 = vpack.c.bf16 %v483_v14, %v482_v13  ;;  %v490_v24 = vld [vmem:[#allocation8 + $0x50] sm:$0xff] }
  0x8a   :  { %v896_v12 = vpack.c.bf16 %v481_v11, %v480_v10  ;;  %v488_v21 = vld [vmem:[#allocation8 + $0x40] sm:$0xff]  ;;  %v494_v30 = vld [vmem:[#allocation8 + $0x70] sm:$0xff] }
  0x8b   :  { %v492_v27 = vld [vmem:[#allocation8 + $0x60] sm:$0xff] }
  0x8c   :  { %879 = vmatpush3.bf16.msra.mxu0 %v878_v16  ;;  %897 = vmatpush3.bf16.msra.mxu1 %v896_v12  ;;  %v484_v16 = vld [vmem:[#allocation8 + $0x20] sm:$0xff] }
  0x8d   :  { %880 = vmatprep.subr.bf16.mxu0 %v1158_v1  ;;  %898 = vmatprep.subr.bf16.mxu1 %v1158_v1  ;;  %v902_v18 = vpack.c.bf16 %v485_v17, %v484_v16 }
  0x90   :  { %882 = vmatpush3.bf16.msra.mxu0 %v881_v19  ;;  %900 = vmatpush3.bf16.msra.mxu1 %v899_v15  ;;  %v486_v19 = vld [vmem:[#allocation8 + $0x30] sm:$0xff]  ;;  %v440_v15 = vld [vmem:[%s1424_s9] sm:$0x1]  ;;  %s1160_s9 = smov [#allocation14]  }
  0x91   :  { %883 = vmatprep.subr.bf16.mxu0 %v1158_v1  ;;  %901 = vmatprep.subr.bf16.mxu1 %v1158_v1 }
  0x94   :  { %885 = vmatpush3.bf16.msra.mxu0 %v884_v22  ;;  %903 = vmatpush3.bf16.msra.mxu1 %v902_v18  ;;  %v489_v22 = vld [vmem:[#allocation8 + $0x48] sm:$0xff]  ;;  %v441_v18 = vld [vmem:[%s1425_s10] sm:$0x1]  ;;  %s674_s10 = sshll.u32 %s1160_s9, 4  ;;  %s675_s10 = int_to_ptr.vmem [resolvable:$true] %s674_s10 }
  0x95   :  { %886 = vmatprep.subr.bf16.mxu0 %v1158_v1  ;;  %904 = vmatprep.subr.bf16.mxu1 %v1158_v1  ;;  %v908_v23 = vpack.c.bf16 %v489_v22, %v488_v21  ;;  %s1115_s20 = scalar_lea.vmem %s675_s10, 128  ;;  %p1120_p1 = scmp.lt.s32.totalorder %s675_s10, %s675_s10 }
  0x96   :  { %p1116_p0 = scmp.ne.s32.totalorder %s675_s10, %s1115_s20  ;;  %p1121_p2 = scmp.lt.s32.totalorder %s1115_s20, %s1115_s20 }
  0x98   :  { %888 = vmatpush3.bf16.msra.mxu0 %v887_v25  ;;  %v491_v25 = vld [vmem:[#allocation8 + $0x58] sm:$0xff]  ;;  %p1122_p3 = por %p1121_p2, %p1120_p1 }
  0x99   :  { %889 = vmatprep.subr.bf16.mxu0 %v1158_v1  ;;  %v911_v26 = vpack.c.bf16 %v491_v25, %v490_v24  ;;  %v588_v25 = vld [vmem:[#allocation11 + $0x70] sm:$0xff] }
  0x9a   :  { %p1123_p4 = pnand %p1122_p3, %p1116_p0 }
  0x9c   :  { %891 = vmatpush3.bf16.msra.mxu0 %v890_v28  ;;  %v493_v28 = vld [vmem:[#allocation8 + $0x68] sm:$0xff] }
  0x9d   :  { %892 = vmatprep.subr.bf16.mxu0 %v1158_v1  ;;  %v914_v29 = vpack.c.bf16 %v493_v28, %v492_v27  ;;  %v692_v28 = vld [vmem:[#allocation10] ss:$0 sm:$0xff] }
  0xa0   :  { %894 = vmatpush3.bf16.msra.mxu0 %v893_v31  ;;  %v495_v31 = vld [vmem:[#allocation8 + $0x78] sm:$0xff] }
  0xa1   :  { %919 = vmatprep.subr.bf16.mxu0 %v1158_v1 }
 0x155   :  { %v217_v32 = vpop.f32.mrb[0].mxu1 }
 0x156   :  { %v754_v33 = vpop.f32.mrb[1].mxu1 }
 0x157   :  { %v574_v33 = vld [vmem:[#allocation11] sm:$0xff] }
 0x159   :  { %v295_v34 = vpop.f32.mrb[2].mxu1 }
 0x15a   :  { %v296_v36 = vadd.f32 %v295_v34, %v217_v32  ;;  %v761_v37 = vpop.f32.mrb[3].mxu1  ;;  %v917_v32 = vpack.c.bf16 %v495_v31, %v494_v30  ;;  %v575_v34 = vld [vmem:[#allocation11 + $0x8] sm:$0xff] }
 0x15b   :  { %v577_v37 = vld [vmem:[#allocation11 + $0x18] sm:$0xff] }
 0x15c   :  { %v306_v38 = vadd.f32 %v690_v35, %v296_v36  ;;  %v576_v35 = vld [vmem:[#allocation11 + $0x10] sm:$0xff]  ;;  %v920_v36 = vpack.c.bf16 %v575_v34, %v574_v33  ;;  %v693_v33 = vld [vmem:[#allocation13] ss:$0 sm:$0xff] }
 0x15e   :  { %v309_v39 = vrot.slane %v306_v38, 4  ;;  %v316_v40 = vmul.f32 %v306_v38, %v306_v38 }
 0x160   :  { %v310_v41 = vadd.f32 %v309_v39, %v306_v38  ;;  %v317_v42 = vrot.slane %v316_v40, 4  ;;  %v578_v39 = vld [vmem:[#allocation11 + $0x20] sm:$0xff] }
 0x162   :  { %v311_v43 = vrot.slane %v310_v41, 2  ;;  %v318_v44 = vadd.f32 %v317_v42, %v316_v40  ;;  %v579_v40 = vld [vmem:[#allocation11 + $0x28] sm:$0xff]  ;;  %v580_v42 = vld [vmem:[#allocation11 + $0x30] sm:$0xff] }
 0x164   :  { %v312_v45 = vadd.f32 %v311_v43, %v310_v41  ;;  %v319_v46 = vrot.slane %v318_v44, 2  ;;  %v926_v41 = vpack.c.bf16 %v579_v40, %v578_v39  ;;  %v581_v43 = vld [vmem:[#allocation11 + $0x38] sm:$0xff] }
 0x166   :  { %v313_v47 = vrot.slane %v312_v45, 1  ;;  %v320_v48 = vadd.f32 %v319_v46, %v318_v44  ;;  %v929_v44 = vpack.c.bf16 %v581_v43, %v580_v42  ;;  %v583_v46 = vld [vmem:[#allocation11 + $0x48] sm:$0xff] }
 0x168   :  { %v321_v49 = vrot.slane %v320_v48, 1  ;;  %v314_v50 = vadd.f32 %v313_v47, %v312_v45  ;;  %v582_v45 = vld [vmem:[#allocation11 + $0x40] sm:$0xff] }
 0x169   :  { %v932_v47 = vpack.c.bf16 %v583_v46, %v582_v45 }
 0x16a   :  { %v322_v51 = vadd.f32 %v321_v49, %v320_v48  ;;  %v315_v52 = vmul.f32 0.125, %v314_v50  ;;  %v584_v48 = vld [vmem:[#allocation11 + $0x50] sm:$0xff]  ;;  %v585_v49 = vld [vmem:[#allocation11 + $0x58] sm:$0xff] }
 0x16b   :  { %v935_v50 = vpack.c.bf16 %v585_v49, %v584_v48 }
 0x16c   :  { %v323_v53 = vmul.f32 0.125, %v322_v51  ;;  %v324_v54 = vmul.f32 %v315_v52, %v315_v52  ;;  %v586_v51 = vld [vmem:[#allocation11 + $0x60] sm:$0xff] }
 0x16e   :  { %v325_v55 = vsub.f32 %v323_v53, %v324_v54  ;;  %v691_v54 = vld [vmem:[%s1423_s8] ss:$0 sm:$0xff] }
 0x170   :  { %v326_v56 = vmax.f32 %v325_v55, 0.0 }
 0x172   :  { %v327_v57 = vadd.f32 1e-05, %v326_v56 }
 0x174   :  { %957 = vrsqrt.f32 %v327_v57 }
 0x17e   :  { %v958_v62 = vpop.eup %957 }
 0x17f   :  { %v329_v63 = vmul.f32 %v958_v62, %v307_v60 }
 0x181   :  { %v330_v3 = vmul.f32 %v329_v63, %v315_v52  ;;  %v336_v4 = vrot.slane %v329_v63, %v1369_v61  ;;  %v587_v52 = vld [vmem:[#allocation11 + $0x68] sm:$0xff] }
 0x182   :  { %v938_v53 = vpack.c.bf16 %v587_v52, %v586_v51 }
 0x183   :  { %v331_v5 = vsub.f32 %v308_v2, %v330_v3  ;;  %v338_v6 = vmul.f32 %v336_v4, %v306_v38  ;;  %v923_v38 = vpack.c.bf16 %v577_v37, %v576_v35 }
 0x185   :  { %v343_v7 = vrot.slane %v331_v5, %v1369_v61 }
 0x187   :  { %v345_v8 = vadd.f32 %v343_v7, %v338_v6 }
 0x189   :  { %v346_v9 = vmax.f32 %v345_v8, 0.0 }
 0x18b   :  { %795 = vmatmul.mubr.f32.vlgmr.msra.gmra.mrb[0].mxu0 %v346_v9 }
 0x18c   :  { %864 = vmatprep.mubr.msk.f32.mxu0 %vm1157_vm0, %v1156_v0  ;;  %v487_v0 = vld [vmem:[#allocation8 + $0x38] sm:$0xff]  ;;  %921 = vmatpush3.bf16.msra.mxu0 %v920_v36 }
 0x18d   :  { %v905_v20 = vpack.c.bf16 %v487_v0, %v486_v19  ;;  %922 = vmatprep.subr.bf16.mxu0 %v1158_v1 }
 0x18f   :  { %906 = vmatpush3.bf16.msra.mxu1 %v905_v20 }
 0x190   :  { %907 = vmatprep.subr.bf16.mxu1 %v1158_v1  ;;  %924 = vmatpush3.bf16.msra.mxu0 %v923_v38 }
 0x191   :  { %925 = vmatprep.subr.bf16.mxu0 %v1158_v1 }
 0x193   :  { %909 = vmatpush3.bf16.msra.mxu1 %v908_v23 }
 0x194   :  { %910 = vmatprep.subr.bf16.mxu1 %v1158_v1  ;;  %927 = vmatpush3.bf16.msra.mxu0 %v926_v41 }
 0x195   :  { %928 = vmatprep.subr.bf16.mxu0 %v1158_v1 }
 0x197   :  { %912 = vmatpush3.bf16.msra.mxu1 %v911_v26  ;;  %v589_v26 = vld [vmem:[#allocation11 + $0x78] sm:$0xff] }
 0x198   :  { %913 = vmatprep.subr.bf16.mxu1 %v1158_v1  ;;  %930 = vmatpush3.bf16.msra.mxu0 %v929_v44  ;;  %v941_v27 = vpack.c.bf16 %v589_v26, %v588_v25 }
 0x199   :  { %931 = vmatprep.subr.bf16.mxu0 %v1158_v1 }
 0x19b   :  { %915 = vmatpush3.bf16.msra.mxu1 %v914_v29 }
 0x19c   :  { %916 = vmatprep.subr.bf16.mxu1 %v1158_v1  ;;  %933 = vmatpush3.bf16.msra.mxu0 %v932_v47 }
 0x19d   :  { %934 = vmatprep.subr.bf16.mxu0 %v1158_v1 }
 0x19f   :  { %918 = vmatpush3.bf16.msra.mxu1 %v917_v32 }
 0x1a0   :  { %936 = vmatpush3.bf16.msra.mxu0 %v935_v50 }
 0x1a1   :  { %937 = vmatprep.subr.bf16.mxu0 %v1158_v1 }
 0x1a4   :  { %939 = vmatpush3.bf16.msra.mxu0 %v938_v53 }
 0x1a5   :  { %940 = vmatprep.subr.bf16.mxu0 %v1158_v1 }
 0x1a8   :  { %942 = vmatpush3.bf16.msra.mxu0 %v941_v27 }
 0x25e   :  { %v436_v55 = vpop.f32.mrb[0].mxu0 }
 0x25f   :  { %v437_v56 = vadd.f32 %v691_v54, %v436_v55  ;;  %v796_v57 = vpop.f32.mrb[1].mxu0 }
 0x261   :  { %v442_v58 = vrot.slane %v437_v56, 4  ;;  %v449_v59 = vmul.f32 %v437_v56, %v437_v56 }
 0x263   :  { %v443_v60 = vadd.f32 %v442_v58, %v437_v56  ;;  %v450_v62 = vrot.slane %v449_v59, 4 }
 0x265   :  { %v444_v63 = vrot.slane %v443_v60, 2  ;;  %v451_v2 = vadd.f32 %v450_v62, %v449_v59 }
 0x267   :  { %v445_v3 = vadd.f32 %v444_v63, %v443_v60  ;;  %v452_v4 = vrot.slane %v451_v2, 2 }
 0x269   :  { %v446_v5 = vrot.slane %v445_v3, 1  ;;  %v453_v6 = vadd.f32 %v452_v4, %v451_v2 }
 0x26b   :  { %v447_v7 = vadd.f32 %v446_v5, %v445_v3  ;;  %v454_v8 = vrot.slane %v453_v6, 1 }
 0x26d   :  { %v448_v1 = vmul.f32 0.125, %v447_v7  ;;  %v455_v9 = vadd.f32 %v454_v8, %v453_v6 }
 0x26f   :  { %v456_v10 = vmul.f32 0.125, %v455_v9  ;;  %v457_v11 = vmul.f32 %v448_v1, %v448_v1 }
 0x271   :  { %v458_v12 = vsub.f32 %v456_v10, %v457_v11 }
 0x273   :  { %v459_v13 = vmax.f32 %v458_v12, 0.0 }
 0x275   :  { %v460_v14 = vadd.f32 1e-05, %v459_v13 }
 0x277   :  { %959 = vrsqrt.f32 %v460_v14 }
 0x281   :  { %v960_v16 = vpop.eup %959 }
 0x282   :  { %v462_v17 = vmul.f32 %v960_v16, %v440_v15 }
 0x284   :  { %v469_v19 = vrot.slane %v462_v17, %v1369_v61  ;;  %v463_v0 = vmul.f32 %v462_v17, %v448_v1 }
 0x286   :  { %v464_v20 = vsub.f32 %v441_v18, %v463_v0  ;;  %v471_v21 = vmul.f32 %v469_v19, %v437_v56 }
 0x288   :  { %v476_v22 = vrot.slane %v464_v20, %v1369_v61 }
 0x28a   :  { %v478_v23 = vadd.f32 %v476_v22, %v471_v21 }
 0x28c   :  { %v479_v24 = vmax.f32 %v478_v23, 0.0 }
 0x28e   :  { %830 = vmatmul.mubr.f32.vlgmr.msra.gmra.mrb[4].mxu1 %v479_v24 }
 0x361   :  { %v569_v29 = vpop.f32.mrb[4].mxu1 }
 0x362   :  { %v570_v30 = vadd.f32 %v692_v28, %v569_v29  ;;  %v831_v31 = vpop.f32.mrb[5].mxu1 }
 0x364   :  { %v573_v32 = vmax.f32 %v570_v30, 0.0 }
 0x366   :  { %865 = vmatmul.mubr.f32.vlgmr.msra.gmra.mrb[2].mxu0 %v573_v32 }
 0x439   :  { %v663_v34 = vpop.f32.mrb[2].mxu0 }
 0x43a   :  { %v664_v35 = vadd.f32 %v693_v33, %v663_v34  ;;  %v866_v36 = vpop.f32.mrb[3].mxu0 }
 0x43c   :  { %667 = vst [vmem:[#allocation14] sm:$0xff] %v664_v35 }
 0x43d   :  { %1126 = shalt.err (!%p1123_p4)
}
 0x43e   :  { %s1127_s1 = scalar_lea.hbm %s1430_s15, 128 }
 0x43f   :  { %p1128_p5 = scmp.ne.s32.totalorder %s1430_s15, %s1127_s1  ;;  %p1131_p6 = scmp.lt.u32.totalorder %s1127_s1, %s1430_s15 }
 0x441   :  { %p1133_p7 = pnand %p1131_p6, %p1128_p5 }
 0x443   :  { %1136 = shalt.err (!%p1133_p7)
}
 0x444   :  { %677 = dma.vmem_to_hbm [thread:$0]  %s675_s10, 128, %s1430_s15, [#allocation4]  }
 0x445   :  { %1145 = dma.done.wait [#allocation4], 128  }
 0x446   :  { %1146 = vsyncadd [#allocation4], 4294967168 }
 0x447   :  { %681 = vsyncpa [#allocation3], 1 }
 0x448   :  { %682 = vsyncpa [#allocation6], 1 }
 0x449   :  { %683 = vsyncpa [#allocation9], 1 }
 0x44a   :  { %684 = vsyncpa [#allocation12], 1 }
 0x44b   :  { %685 = vsyncpa [#allocation4], 1 }

</bundles_post_ra>
